<compile_context>
chip_gen: v7x
topology: tpu7x:2x2x1
jax: 0.10.0
libtpu: 0.0.40
codegen_flags: <defaults>
</compile_context>

<pallas_src>
import functools

import jax
import jax.numpy as jnp
import numpy as np
from jax.experimental import pallas as pl
from jax.experimental.pallas import tpu as pltpu

CLASS_NUM = 3
GAMMA = 0.5
SMOOTH = 0.0  # forward() overwrites self.smooth with 0.0

LANES = 128
_X_BUFFER_BUDGET = 2 * 1024 * 1024  # ~2 MiB per (double-buffered) x tile


def _el_dice_kernel(x_ref, t_ref, loss_ref, acc_ref, *, class_num, gamma, smooth):
    # x_ref:   (N, C, bs, 128) logits tile (original dtype)
    # t_ref:   (N, bs, 128) int32 labels tile
    # loss_ref:(1,) SMEM scalar output
    # acc_ref: (3*(class_num-1),) SMEM f32 accumulators:
    #          [intersect_c, sum_x_c, sum_t_c] for c = 1..class_num-1
    j = pl.program_id(0)
    n_cls = class_num - 1

    @pl.when(j == 0)
    def _init():
        for k in range(3 * n_cls):
            acc_ref[k] = jnp.float32(0.0)

    t = t_ref[...]  # load target tile once, reuse for every class

    for cls in range(1, class_num):
        xc = jnp.exp(x_ref[:, cls, :, :].astype(jnp.float32))  # (N, bs, 128)
        tc = (t == cls).astype(jnp.float32)
        base = 3 * (cls - 1)
        acc_ref[base + 0] = acc_ref[base + 0] + jnp.sum(xc * tc)
        acc_ref[base + 1] = acc_ref[base + 1] + jnp.sum(xc)
        acc_ref[base + 2] = acc_ref[base + 2] + jnp.sum(tc)

    @pl.when(j == pl.num_programs(0) - 1)
    def _finalize():
        total = jnp.float32(0.0)
        for k in range(n_cls):
            inter = acc_ref[3 * k + 0]
            sum_x = acc_ref[3 * k + 1]
            sum_t = acc_ref[3 * k + 2]
            dice = jnp.where(
                sum_t == 0.0,
                jnp.float32(1.0),
                (2.0 * inter + smooth) / (sum_x + sum_t + smooth),
            )
            neg_log = -jnp.log(dice)
            if gamma == 0.5:
                term = jnp.sqrt(neg_log)  # cheaper/exact vs pow(x, 0.5)
            else:
                term = jnp.power(neg_log, jnp.float32(gamma))
            total = total + term
        loss_ref[0] = total / jnp.float32(class_num - 1)


def el_dice_loss(x, target, *, class_num=CLASS_NUM, gamma=GAMMA, smooth=SMOOTH):
    """x: (N, C, H, W) float logits; target: (N, H, W) int labels. Returns (1,) f32."""
    n, c, h, w = x.shape
    hw = h * w

    g = pl.cdiv(hw, LANES)  # number of 128-lane rows per (n, c) image slab
    itemsize = jnp.dtype(x.dtype).itemsize
    bytes_per_row = n * c * LANES * itemsize  # x-tile bytes added per sublane-row
    max_bs = max(8, int(_X_BUFFER_BUDGET // max(1, bytes_per_row)))
    max_bs = max(8, (max_bs // 8) * 8)

    if g <= max_bs:
        bs = g            # single row-tile; block dim == full dim is always legal
        gp = g
    else:
        bs = min(max_bs, 512)
        bs = max(8, (bs // 8) * 8)
        gp = ((g + bs - 1) // bs) * bs
    hwp = gp * LANES

    # Free reshapes (contiguous); no transpose, no dtype upcast of x.
    x_flat = x.reshape(n, c, hw)
    t_flat = target.reshape(n, hw).astype(jnp.int32)
    if hwp != hw:
        # Pad only when H*W isn't a multiple of the tile.  exp(-1e9) == 0.0 in
        # f32, and class 0 is never counted, so padding contributes nothing.
        x_flat = jnp.pad(
            x_flat, ((0, 0), (0, 0), (0, hwp - hw)), constant_values=-1e9
        )
        t_flat = jnp.pad(t_flat, ((0, 0), (0, hwp - hw)), constant_values=0)

    x_tiled = x_flat.reshape(n, c, gp, LANES)
    t_tiled = t_flat.reshape(n, gp, LANES)

    num_tiles = gp // bs
    kernel = functools.partial(
        _el_dice_kernel, class_num=class_num, gamma=gamma, smooth=smooth
    )

    return pl.pallas_call(
        kernel,
        out_shape=jax.ShapeDtypeStruct((1,), jnp.float32),
        grid_spec=pltpu.PrefetchScalarGridSpec(
            num_scalar_prefetch=0,
            grid=(num_tiles,),
            in_specs=[
                # One spatial tile of all channels: (N, C, bs, 128)
                pl.BlockSpec((n, c, bs, LANES), lambda j: (0, 0, j, 0)),
                # Matching target tile: (N, bs, 128)
                pl.BlockSpec((n, bs, LANES), lambda j: (0, j, 0)),
            ],
            out_specs=pl.BlockSpec((1,), lambda j: (0,), memory_space=pltpu.SMEM),
            scratch_shapes=[pltpu.SMEM((3 * (class_num - 1),), jnp.float32)],
        ),
        compiler_params=pltpu.CompilerParams(
            # Accumulator carried across the spatial axis -> arbitrary.
            dimension_semantics=("arbitrary",),
            vmem_limit_bytes=32 * 1024 * 1024,
        ),
    )(x_tiled, t_tiled)


def el_dice_loss_ref(x, target, *, class_num=CLASS_NUM, gamma=GAMMA, smooth=SMOOTH):
    """Pure-JAX reference mirroring the PyTorch forward."""
    xe = jnp.exp(x.astype(jnp.float32))
    dice_sum = jnp.float32(0.0)
    for i in range(1, class_num):
        xi = xe[:, i, :, :]
        ti = (target == i).astype(jnp.float32)
        intersect = jnp.sum(xi * ti)
        union = jnp.sum(xi) + jnp.sum(ti)
        dice = jnp.where(
            jnp.sum(ti) == 0.0, 1.0, (2.0 * intersect + smooth) / (union + smooth)
        )
        dice_sum = dice_sum + jnp.power(-jnp.log(dice), gamma)
    return (dice_sum / (class_num - 1)).reshape(1)


if __name__ == "__main__":
    key = jax.random.PRNGKey(0)
    k1, k2 = jax.random.split(key)

    N, C, H, W = 2, CLASS_NUM, 16, 16
    x = jax.random.normal(k1, (N, C, H, W), dtype=jnp.float32)
    target = jax.random.randint(k2, (N, H, W), 0, CLASS_NUM, dtype=jnp.int32)

    loss = el_dice_loss(x, target)
    loss = jax.block_until_ready(loss)

    loss_ref = jax.block_until_ready(el_dice_loss_ref(x, target))
    np.testing.assert_allclose(
        np.asarray(loss), np.asarray(loss_ref), rtol=1e-5, atol=1e-6
    )

    print("KERNEL_OK")
</pallas_src>

<mosaic_0001>
module attributes {stable_mosaic.version = 11 : i64} {
  func.func @_el_dice_kernel(%arg0: i32, %arg1: memref<2x3x2x128xf32, #tpu.memory_space<vmem>>, %arg2: memref<2x2x128xi32, #tpu.memory_space<vmem>>, %arg3: memref<1xf32, #tpu.memory_space<smem>>, %arg4: memref<6xf32, #tpu.memory_space<smem>>) attributes {dimension_semantics = [#tpu.dimension_semantics<arbitrary>], iteration_bounds = array<i64: 1>, scalar_prefetch = 0 : i64, scratch_operands = 1 : i64, tpu.core_type = #tpu.core_type<tc>, window_params = [{transform_indices = @transform_0, window_bounds = array<i64: 2, 3, 2, 128>}, {transform_indices = @transform_1, window_bounds = array<i64: 2, 2, 128>}, {transform_indices = @transform_2, window_bounds = array<i64: 1>}]} {
    %c0_i32 = arith.constant 0 : i32
    %0 = arith.cmpi eq, %arg0, %c0_i32 : i32
    %1 = arith.extui %0 : i1 to i32
    %c0_i32_0 = arith.constant 0 : i32
    %2 = arith.cmpi ne, %1, %c0_i32_0 : i32
    scf.if %2 {
      %cst_25 = arith.constant 0.000000e+00 : f32
      %c0_26 = arith.constant 0 : index
      %65 = memref.load %arg4[%c0_26] : memref<6xf32, #tpu.memory_space<smem>>
      memref.store %cst_25, %arg4[%c0_26] : memref<6xf32, #tpu.memory_space<smem>>
      %cst_27 = arith.constant 0.000000e+00 : f32
      %c1_28 = arith.constant 1 : index
      %66 = memref.load %arg4[%c1_28] : memref<6xf32, #tpu.memory_space<smem>>
      memref.store %cst_27, %arg4[%c1_28] : memref<6xf32, #tpu.memory_space<smem>>
      %cst_29 = arith.constant 0.000000e+00 : f32
      %c2_30 = arith.constant 2 : index
      %67 = memref.load %arg4[%c2_30] : memref<6xf32, #tpu.memory_space<smem>>
      memref.store %cst_29, %arg4[%c2_30] : memref<6xf32, #tpu.memory_space<smem>>
      %cst_31 = arith.constant 0.000000e+00 : f32
      %c3_32 = arith.constant 3 : index
      %68 = memref.load %arg4[%c3_32] : memref<6xf32, #tpu.memory_space<smem>>
      memref.store %cst_31, %arg4[%c3_32] : memref<6xf32, #tpu.memory_space<smem>>
      %cst_33 = arith.constant 0.000000e+00 : f32
      %c4_34 = arith.constant 4 : index
      %69 = memref.load %arg4[%c4_34] : memref<6xf32, #tpu.memory_space<smem>>
      memref.store %cst_33, %arg4[%c4_34] : memref<6xf32, #tpu.memory_space<smem>>
      %cst_35 = arith.constant 0.000000e+00 : f32
      %c5_36 = arith.constant 5 : index
      %70 = memref.load %arg4[%c5_36] : memref<6xf32, #tpu.memory_space<smem>>
      memref.store %cst_35, %arg4[%c5_36] : memref<6xf32, #tpu.memory_space<smem>>
    } else {
    }
    %c0 = arith.constant 0 : index
    %c0_1 = arith.constant 0 : index
    %c0_2 = arith.constant 0 : index
    %3 = vector.load %arg2[%c0, %c0_1, %c0_2] : memref<2x2x128xi32, #tpu.memory_space<vmem>>, vector<2x2x128xi32>
    %c0_3 = arith.constant 0 : index
    %c1 = arith.constant 1 : index
    %c0_4 = arith.constant 0 : index
    %c0_5 = arith.constant 0 : index
    %4 = vector.load %arg1[%c0_3, %c1, %c0_4, %c0_5] : memref<2x3x2x128xf32, #tpu.memory_space<vmem>>, vector<2x1x2x128xf32>
    %5 = vector.shape_cast %4 : vector<2x1x2x128xf32> to vector<2x2x128xf32>
    %6 = math.exp %5 : vector<2x2x128xf32>
    %c1_i32 = arith.constant 1 : i32
    %7 = vector.broadcast %c1_i32 : i32 to vector<2x2x128xi32>
    %8 = arith.cmpi eq, %3, %7 : vector<2x2x128xi32>
    %9 = arith.extui %8 : vector<2x2x128xi1> to vector<2x2x128xi32>
    %10 = arith.sitofp %9 : vector<2x2x128xi32> to vector<2x2x128xf32>
    %c0_6 = arith.constant 0 : index
    %11 = memref.load %arg4[%c0_6] : memref<6xf32, #tpu.memory_space<smem>>
    %12 = arith.mulf %6, %10 : vector<2x2x128xf32>
    %13 = vector.shape_cast %12 : vector<2x2x128xf32> to vector<1x2x2x128xf32>
    %cst = arith.constant dense<0.000000e+00> : vector<1xf32>
    %14 = vector.multi_reduction <add>, %13, %cst [1, 2, 3] : vector<1x2x2x128xf32> to vector<1xf32>
    %15 = vector.shape_cast %14 : vector<1xf32> to vector<1x1x1x1xf32>
    %16 = vector.extract %15[0, 0, 0, 0] : f32 from vector<1x1x1x1xf32>
    %17 = arith.addf %11, %16 : f32
    %c0_7 = arith.constant 0 : index
    %18 = memref.load %arg4[%c0_7] : memref<6xf32, #tpu.memory_space<smem>>
    memref.store %17, %arg4[%c0_7] : memref<6xf32, #tpu.memory_space<smem>>
    %c1_8 = arith.constant 1 : index
    %19 = memref.load %arg4[%c1_8] : memref<6xf32, #tpu.memory_space<smem>>
    %20 = vector.shape_cast %6 : vector<2x2x128xf32> to vector<1x2x2x128xf32>
    %cst_9 = arith.constant dense<0.000000e+00> : vector<1xf32>
    %21 = vector.multi_reduction <add>, %20, %cst_9 [1, 2, 3] : vector<1x2x2x128xf32> to vector<1xf32>
    %22 = vector.shape_cast %21 : vector<1xf32> to vector<1x1x1x1xf32>
    %23 = vector.extract %22[0, 0, 0, 0] : f32 from vector<1x1x1x1xf32>
    %24 = arith.addf %19, %23 : f32
    %c1_10 = arith.constant 1 : index
    %25 = memref.load %arg4[%c1_10] : memref<6xf32, #tpu.memory_space<smem>>
    memref.store %24, %arg4[%c1_10] : memref<6xf32, #tpu.memory_space<smem>>
    %c2 = arith.constant 2 : index
    %26 = memref.load %arg4[%c2] : memref<6xf32, #tpu.memory_space<smem>>
    %27 = vector.shape_cast %10 : vector<2x2x128xf32> to vector<1x2x2x128xf32>
    %cst_11 = arith.constant dense<0.000000e+00> : vector<1xf32>
    %28 = vector.multi_reduction <add>, %27, %cst_11 [1, 2, 3] : vector<1x2x2x128xf32> to vector<1xf32>
    %29 = vector.shape_cast %28 : vector<1xf32> to vector<1x1x1x1xf32>
    %30 = vector.extract %29[0, 0, 0, 0] : f32 from vector<1x1x1x1xf32>
    %31 = arith.addf %26, %30 : f32
    %c2_12 = arith.constant 2 : index
    %32 = memref.load %arg4[%c2_12] : memref<6xf32, #tpu.memory_space<smem>>
    memref.store %31, %arg4[%c2_12] : memref<6xf32, #tpu.memory_space<smem>>
    %c0_13 = arith.constant 0 : index
    %c2_14 = arith.constant 2 : index
    %c0_15 = arith.constant 0 : index
    %c0_16 = arith.constant 0 : index
    %33 = vector.load %arg1[%c0_13, %c2_14, %c0_15, %c0_16] : memref<2x3x2x128xf32, #tpu.memory_space<vmem>>, vector<2x1x2x128xf32>
    %34 = vector.shape_cast %33 : vector<2x1x2x128xf32> to vector<2x2x128xf32>
    %35 = math.exp %34 : vector<2x2x128xf32>
    %c2_i32 = arith.constant 2 : i32
    %36 = vector.broadcast %c2_i32 : i32 to vector<2x2x128xi32>
    %37 = arith.cmpi eq, %3, %36 : vector<2x2x128xi32>
    %38 = arith.extui %37 : vector<2x2x128xi1> to vector<2x2x128xi32>
    %39 = arith.sitofp %38 : vector<2x2x128xi32> to vector<2x2x128xf32>
    %c3 = arith.constant 3 : index
    %40 = memref.load %arg4[%c3] : memref<6xf32, #tpu.memory_space<smem>>
    %41 = arith.mulf %35, %39 : vector<2x2x128xf32>
    %42 = vector.shape_cast %41 : vector<2x2x128xf32> to vector<1x2x2x128xf32>
    %cst_17 = arith.constant dense<0.000000e+00> : vector<1xf32>
    %43 = vector.multi_reduction <add>, %42, %cst_17 [1, 2, 3] : vector<1x2x2x128xf32> to vector<1xf32>
    %44 = vector.shape_cast %43 : vector<1xf32> to vector<1x1x1x1xf32>
    %45 = vector.extract %44[0, 0, 0, 0] : f32 from vector<1x1x1x1xf32>
    %46 = arith.addf %40, %45 : f32
    %c3_18 = arith.constant 3 : index
    %47 = memref.load %arg4[%c3_18] : memref<6xf32, #tpu.memory_space<smem>>
    memref.store %46, %arg4[%c3_18] : memref<6xf32, #tpu.memory_space<smem>>
    %c4 = arith.constant 4 : index
    %48 = memref.load %arg4[%c4] : memref<6xf32, #tpu.memory_space<smem>>
    %49 = vector.shape_cast %35 : vector<2x2x128xf32> to vector<1x2x2x128xf32>
    %cst_19 = arith.constant dense<0.000000e+00> : vector<1xf32>
    %50 = vector.multi_reduction <add>, %49, %cst_19 [1, 2, 3] : vector<1x2x2x128xf32> to vector<1xf32>
    %51 = vector.shape_cast %50 : vector<1xf32> to vector<1x1x1x1xf32>
    %52 = vector.extract %51[0, 0, 0, 0] : f32 from vector<1x1x1x1xf32>
    %53 = arith.addf %48, %52 : f32
    %c4_20 = arith.constant 4 : index
    %54 = memref.load %arg4[%c4_20] : memref<6xf32, #tpu.memory_space<smem>>
    memref.store %53, %arg4[%c4_20] : memref<6xf32, #tpu.memory_space<smem>>
    %c5 = arith.constant 5 : index
    %55 = memref.load %arg4[%c5] : memref<6xf32, #tpu.memory_space<smem>>
    %56 = vector.shape_cast %39 : vector<2x2x128xf32> to vector<1x2x2x128xf32>
    %cst_21 = arith.constant dense<0.000000e+00> : vector<1xf32>
    %57 = vector.multi_reduction <add>, %56, %cst_21 [1, 2, 3] : vector<1x2x2x128xf32> to vector<1xf32>
    %58 = vector.shape_cast %57 : vector<1xf32> to vector<1x1x1x1xf32>
    %59 = vector.extract %58[0, 0, 0, 0] : f32 from vector<1x1x1x1xf32>
    %60 = arith.addf %55, %59 : f32
    %c5_22 = arith.constant 5 : index
    %61 = memref.load %arg4[%c5_22] : memref<6xf32, #tpu.memory_space<smem>>
    memref.store %60, %arg4[%c5_22] : memref<6xf32, #tpu.memory_space<smem>>
    %c0_i32_23 = arith.constant 0 : i32
    %62 = arith.cmpi eq, %arg0, %c0_i32_23 : i32
    %63 = arith.extui %62 : i1 to i32
    %c0_i32_24 = arith.constant 0 : i32
    %64 = arith.cmpi ne, %63, %c0_i32_24 : i32
    scf.if %64 {
      %c0_25 = arith.constant 0 : index
      %65 = memref.load %arg4[%c0_25] : memref<6xf32, #tpu.memory_space<smem>>
      %c1_26 = arith.constant 1 : index
      %66 = memref.load %arg4[%c1_26] : memref<6xf32, #tpu.memory_space<smem>>
      %c2_27 = arith.constant 2 : index
      %67 = memref.load %arg4[%c2_27] : memref<6xf32, #tpu.memory_space<smem>>
      %cst_28 = arith.constant 0.000000e+00 : f32
      %68 = arith.cmpf oeq, %67, %cst_28 : f32
      %cst_29 = arith.constant 2.000000e+00 : f32
      %69 = arith.mulf %cst_29, %65 : f32
      %cst_30 = arith.constant 0.000000e+00 : f32
      %70 = arith.addf %69, %cst_30 : f32
      %71 = arith.addf %66, %67 : f32
      %cst_31 = arith.constant 0.000000e+00 : f32
      %72 = arith.addf %71, %cst_31 : f32
      %73 = arith.divf %70, %72 : f32
      %cst_32 = arith.constant 1.000000e+00 : f32
      %74 = arith.select %68, %cst_32, %73 : f32
      %75 = math.log %74 : f32
      %cst_33 = arith.constant 0.000000e+00 : f32
      %76 = arith.subf %cst_33, %75 : f32
      %77 = math.sqrt %76 : f32
      %cst_34 = arith.constant 0.000000e+00 : f32
      %78 = arith.addf %cst_34, %77 : f32
      %c3_35 = arith.constant 3 : index
      %79 = memref.load %arg4[%c3_35] : memref<6xf32, #tpu.memory_space<smem>>
      %c4_36 = arith.constant 4 : index
      %80 = memref.load %arg4[%c4_36] : memref<6xf32, #tpu.memory_space<smem>>
      %c5_37 = arith.constant 5 : index
      %81 = memref.load %arg4[%c5_37] : memref<6xf32, #tpu.memory_space<smem>>
      %cst_38 = arith.constant 0.000000e+00 : f32
      %82 = arith.cmpf oeq, %81, %cst_38 : f32
      %cst_39 = arith.constant 2.000000e+00 : f32
      %83 = arith.mulf %cst_39, %79 : f32
      %cst_40 = arith.constant 0.000000e+00 : f32
      %84 = arith.addf %83, %cst_40 : f32
      %85 = arith.addf %80, %81 : f32
      %cst_41 = arith.constant 0.000000e+00 : f32
      %86 = arith.addf %85, %cst_41 : f32
      %87 = arith.divf %84, %86 : f32
      %cst_42 = arith.constant 1.000000e+00 : f32
      %88 = arith.select %82, %cst_42, %87 : f32
      %89 = math.log %88 : f32
      %cst_43 = arith.constant 0.000000e+00 : f32
      %90 = arith.subf %cst_43, %89 : f32
      %91 = math.sqrt %90 : f32
      %92 = arith.addf %78, %91 : f32
      %cst_44 = arith.constant 2.000000e+00 : f32
      %93 = arith.divf %92, %cst_44 : f32
      %c0_45 = arith.constant 0 : index
      %94 = memref.load %arg3[%c0_45] : memref<1xf32, #tpu.memory_space<smem>>
      memref.store %93, %arg3[%c0_45] : memref<1xf32, #tpu.memory_space<smem>>
    } else {
    }
    return
  }
  func.func @transform_0(%arg0: i32) -> (i32, i32, i32, i32) {
    %c0_i32 = arith.constant 0 : i32
    %c0_i32_0 = arith.constant 0 : i32
    %c0_i32_1 = arith.constant 0 : i32
    %c0_i32_2 = arith.constant 0 : i32
    return %c0_i32, %c0_i32_0, %arg0, %c0_i32_1 : i32, i32, i32, i32
  }
  func.func @transform_1(%arg0: i32) -> (i32, i32, i32) {
    %c0_i32 = arith.constant 0 : i32
    %c0_i32_0 = arith.constant 0 : i32
    %c0_i32_1 = arith.constant 0 : i32
    return %c0_i32, %arg0, %c0_i32_0 : i32, i32, i32
  }
  func.func @transform_2(%arg0: i32) -> i32 {
    %c0_i32 = arith.constant 0 : i32
    %c0_i32_0 = arith.constant 0 : i32
    return %c0_i32 : i32
  }
}

</mosaic_0001>

<bundles_post_ra>
// kernel: tpu_custom_call.1
= control target key start
LH: loop header
LB: loop body
LE: loop exit
PB: predicated region body
PF: predicated region fallthrough
CT: control target
= control target key end

     0   :  { %7 = vsyncpa [#allocation4], 0  ;;  %s464_s0 = inlined_call_operand.hbm [shape: f32[2,3,2,128], index: 0, kind: input, shape index: {}]   ;;  %s465_s1 = inlined_call_operand.hbm [shape: s32[2,2,128], index: 1, kind: input, shape index: {}]   ;;  %s466_s2 = inlined_call_operand.hbm [shape: f32[1], index: 2, kind: output, shape index: {}]  }
   0x1   :  { %8 = vsyncpa [#allocation7], 0 }
   0x2   :  { %9 = vsyncpa [#allocation5], 0  ;;  %s388_s9 = smov [#allocation3]   ;;  %s328_s13 = scalar_lea.hbm %s464_s0, 192 }
   0x3   :  { %s15_s10 = sshll.u32 %s388_s9, 4  ;;  %p329_p0 = scmp.ne.s32.totalorder %s464_s0, %s328_s13  ;;  %s16_s10 = int_to_ptr.vmem [resolvable:$true] %s15_s10 }
   0x4   :  { %p332_p1 = scmp.lt.u32.totalorder %s328_s13, %s464_s0 }
   0x6   :  { %p334_p2 = pnand %p332_p1, %p329_p0 }
   0x8   :  { %337 = shalt.err (!%p334_p2)
}
   0x9   :  { %s338_s18 = scalar_lea.vmem %s16_s10, 192  ;;  %p343_p4 = scmp.lt.s32.totalorder %s16_s10, %s16_s10 }
   0xa   :  { %p339_p3 = scmp.ne.s32.totalorder %s16_s10, %s338_s18  ;;  %p344_p5 = scmp.lt.s32.totalorder %s338_s18, %s338_s18 }
   0xc   :  { %p345_p6 = por %p344_p5, %p343_p4 }
   0xe   :  { %p346_p7 = pnand %p345_p6, %p339_p3 }
  0x10   :  { %349 = shalt.err (!%p346_p7)
}
  0x11   :  { %s389_s19 = smov 32   ;;  %s390_s20 = smov 2  }
  0x12   :  { %21 = dma.hbm_to_vmem [thread:$0]  %s464_s0, 192, %s16_s10, [#allocation4], %s389_s19, %s389_s19, %s390_s20  }
  0x13   :  { %s391_s23 = smov [#allocation6]   ;;  %s350_s27 = scalar_lea.hbm %s465_s1, 64 }
  0x14   :  { %s27_s24 = sshll.u32 %s391_s23, 4  ;;  %p351_p8 = scmp.ne.s32.totalorder %s465_s1, %s350_s27  ;;  %s28_s24 = int_to_ptr.vmem [resolvable:$true] %s27_s24 }
  0x15   :  { %p354_p9 = scmp.lt.u32.totalorder %s350_s27, %s465_s1 }
  0x17   :  { %p356_p10 = pnand %p354_p9, %p351_p8 }
  0x19   :  { %359 = shalt.err (!%p356_p10)
}
  0x1a   :  { %s360_s4 = scalar_lea.vmem %s28_s24, 64  ;;  %p365_p12 = scmp.lt.s32.totalorder %s28_s24, %s28_s24 }
  0x1b   :  { %p361_p11 = scmp.ne.s32.totalorder %s28_s24, %s360_s4  ;;  %p366_p13 = scmp.lt.s32.totalorder %s360_s4, %s360_s4 }
  0x1d   :  { %p367_p0 = por %p366_p13, %p365_p12 }
  0x1f   :  { %p368_p1 = pnand %p367_p0, %p361_p11 }
  0x21   :  { %371 = shalt.err (!%p368_p1)
}
  0x22   :  { %33 = dma.hbm_to_vmem [thread:$0]  %s465_s1, 64, %s28_s24, [#allocation7], %s389_s19, %s389_s19, %s390_s20  }
  0x23   :  { %382 = dma.done.wait [#allocation4], 192  }
  0x24   :  { %383 = vsyncadd [#allocation4], 4294967104 }
  0x25   :  { %384 = dma.done.wait [#allocation7], 64  }
  0x26   :  { %385 = vsyncadd [#allocation7], 4294967232  ;;  %vm74_vm0 = vcmask 1041408   ;;  %v56_v0 = vld [vmem:[#allocation6] sm:$0x3]  ;;  %v392_v4 = vmov 0.0  }
  0x27   :  { %v57_v1 = vld [vmem:[#allocation6 + $0x2] sm:$0x3]  ;;  %v59_v2 = vld [vmem:[#allocation3 + $0x2] sm:$0x3]  ;;  %vm65_vm1 = vcmp.eq.s32.totalorder %v56_v0, 1  ;;  %vm129_vm3 = vcmp.eq.s32.totalorder %v56_v0, 2 }
  0x28   :  { %vm66_vm2 = vcmp.eq.s32.totalorder %v57_v1, 1  ;;  %v60_v3 = vld [vmem:[#allocation3 + $0x8] sm:$0x3]  ;;  %v264_v5 = vsel %vm65_vm1, 1.0, %v392_v4  ;;  %v61_v7 = vmul.f32 1.442695, %v59_v2 }
  0x29   :  { %v265_v6 = vsel %vm66_vm2, 1.0, %v392_v4  ;;  %v63_v8 = vmul.f32 1.442695, %v60_v3  ;;  %v107_v9 = vsel %vm74_vm0, %v264_v5, 0.0  ;;  %v123_v11 = vld [vmem:[#allocation3 + $0x4] sm:$0x3] }
  0x2a   :  { %v108_v10 = vsel %vm74_vm0, %v265_v6, 0.0  ;;  %v124_v12 = vld [vmem:[#allocation3 + $0xa] sm:$0x3]  ;;  %308 = vpow2.f32 %v61_v7  ;;  %v125_v14 = vmul.f32 1.442695, %v123_v11  ;;  %vm130_vm4 = vcmp.eq.s32.totalorder %v57_v1, 2 }
  0x2b   :  { %v109_v13 = vadd.f32 %v108_v10, %v107_v9  ;;  %v127_v15 = vmul.f32 1.442695, %v124_v12  ;;  %310 = vpow2.f32 %v63_v8  ;;  %v268_v17 = vsel %vm129_vm3, 1.0, %v392_v4  ;;  %s372_s29 = scalar_lea.hbm %s466_s2, 16 }
  0x2c   :  { %312 = vpow2.f32 %v125_v14  ;;  %v269_v20 = vsel %vm130_vm4, 1.0, %v392_v4  ;;  %v170_v33 = vsel %vm74_vm0, %v268_v17, 0.0  ;;  %p373_p4 = scmp.ne.s32.totalorder %s466_s2, %s372_s29  ;;  %p376_p5 = scmp.lt.u32.totalorder %s372_s29, %s466_s2 }
  0x2d   :  { %110 = vadd.xlane.f32.xlu1 %v109_v13  ;;  %314 = vpow2.f32 %v127_v15  ;;  %v171_v34 = vsel %vm74_vm0, %v269_v20, 0.0 }
  0x2e   :  { %v172_v39 = vadd.f32 %v171_v34, %v170_v33  ;;  %p378_p6 = pnand %p376_p5, %p373_p4 }
  0x34   :  { %v309_v16 = vpop.eup %308 }
  0x35   :  { %v311_v18 = vpop.eup %310  ;;  %v72_v19 = vmul.f32 %v309_v16, %v264_v5  ;;  %v91_v27 = vsel %vm74_vm0, %v309_v16, 0.0 }
  0x36   :  { %v313_v21 = vpop.eup %312  ;;  %v73_v22 = vmul.f32 %v311_v18, %v265_v6  ;;  %v92_v28 = vsel %vm74_vm0, %v311_v18, 0.0 }
  0x37   :  { %v315_v23 = vpop.eup %314  ;;  %v75_v24 = vsel %vm74_vm0, %v72_v19, 0.0  ;;  %v136_v25 = vmul.f32 %v313_v21, %v268_v17  ;;  %v93_v35 = vadd.f32 %v92_v28, %v91_v27  ;;  %v154_v37 = vsel %vm74_vm0, %v313_v21, 0.0 }
  0x38   :  { %v76_v26 = vsel %vm74_vm0, %v73_v22, 0.0  ;;  %v137_v29 = vmul.f32 %v315_v23, %v269_v20  ;;  %v155_v38 = vsel %vm74_vm0, %v315_v23, 0.0 }
  0x39   :  { %v77_v30 = vadd.f32 %v76_v26, %v75_v24  ;;  %v138_v31 = vsel %vm74_vm0, %v136_v25, 0.0  ;;  %v156_v40 = vadd.f32 %v155_v38, %v154_v37 }
  0x3a   :  { %v139_v32 = vsel %vm74_vm0, %v137_v29, 0.0 }
  0x3b   :  { %78 = vadd.xlane.f32.xlu0 %v77_v30  ;;  %v140_v36 = vadd.f32 %v139_v32, %v138_v31 }
  0x3d   :  { %141 = vadd.xlane.f32.xlu1 %v140_v36 }
  0x3f   :  { %94 = vadd.xlane.f32.xlu0 %v93_v35 }
  0x41   :  { %173 = vadd.xlane.f32.xlu1 %v172_v39 }
  0x43   :  { %157 = vadd.xlane.f32.xlu0 %v156_v40 }
  0xba   :  { %v111_v41 = vpop.xlane.xlu1 %110 }
  0xbb   :  { %v112_v42 = vrot.slane %v111_v41, 4 }
  0xbd   :  { %v113_v43 = vadd.f32 %v112_v42, %v111_v41 }
  0xbf   :  { %v114_v49 = vrot.slane %v113_v43, 2 }
  0xc1   :  { %v115_v59 = vadd.f32 %v114_v49, %v113_v43 }
  0xc3   :  { %v116_v6 = vrot.slane %v115_v59, 1 }
  0xc5   :  { %v117_v15 = vadd.f32 %v116_v6, %v115_v59 }
  0xc8   :  { %v79_v44 = vpop.xlane.xlu0 %78 }
  0xc9   :  { %v80_v45 = vrot.slane %v79_v44, 4 }
  0xca   :  { %v142_v46 = vpop.xlane.xlu1 %141 }
  0xcb   :  { %v81_v47 = vadd.f32 %v80_v45, %v79_v44  ;;  %v143_v48 = vrot.slane %v142_v46, 4 }
  0xcc   :  { %v95_v50 = vpop.xlane.xlu0 %94 }
  0xcd   :  { %v82_v51 = vrot.slane %v81_v47, 2  ;;  %v96_v52 = vrot.slane %v95_v50, 4  ;;  %v144_v53 = vadd.f32 %v143_v48, %v142_v46 }
  0xce   :  { %v174_v54 = vpop.xlane.xlu1 %173 }
  0xcf   :  { %v97_v55 = vadd.f32 %v96_v52, %v95_v50  ;;  %v83_v56 = vadd.f32 %v82_v51, %v81_v47  ;;  %v145_v57 = vrot.slane %v144_v53, 2  ;;  %v175_v58 = vrot.slane %v174_v54, 4 }
  0xd0   :  { %v158_v60 = vpop.xlane.xlu0 %157 }
  0xd1   :  { %v98_v61 = vrot.slane %v97_v55, 2  ;;  %v84_v62 = vrot.slane %v83_v56, 1  ;;  %v176_v63 = vadd.f32 %v175_v58, %v174_v54  ;;  %v159_v0 = vrot.slane %v158_v60, 4 }
  0xd2   :  { %v146_v1 = vadd.f32 %v145_v57, %v144_v53 }
  0xd3   :  { %v85_v2 = vadd.f32 %v84_v62, %v83_v56  ;;  %v99_v3 = vadd.f32 %v98_v61, %v97_v55  ;;  %v177_v4 = vrot.slane %v176_v63, 2  ;;  %v160_v5 = vadd.f32 %v159_v0, %v158_v60 }
  0xd4   :  { %v147_v7 = vrot.slane %v146_v1, 1 }
  0xd5   :  { %278 = vpush %v85_v2  ;;  %v100_v8 = vrot.slane %v99_v3, 1  ;;  %v178_v9 = vadd.f32 %v177_v4, %v176_v63  ;;  %v161_v10 = vrot.slane %v160_v5, 2 }
  0xd6   :  { %v148_v13 = vadd.f32 %v147_v7, %v146_v1 }
  0xd7   :  { %v101_v11 = vadd.f32 %v100_v8, %v99_v3  ;;  %v162_v12 = vadd.f32 %v161_v10, %v160_v5  ;;  %v179_v14 = vrot.slane %v178_v9, 1 }
  0xd9   :  { %280 = vpush %v101_v11  ;;  %v163_v16 = vrot.slane %v162_v12, 1  ;;  %v180_v17 = vadd.f32 %v179_v14, %v178_v9 }
  0xda   :  { %282 = vpush %v117_v15 }
  0xdb   :  { %284 = vpush %v148_v13  ;;  %v164_v18 = vadd.f32 %v163_v16, %v162_v12 }
  0xdd   :  { %286 = vpush %v164_v18 }
  0xde   :  { %288 = vpush %v180_v17 }
 0x106   :  { %s279_s1 = spop %278 }
 0x107   :  { %s192_s13 = smul.f32 2.0, %s279_s1 }
 0x10a   :  { %s281_s6 = spop %280 }
 0x10b   :  { %s283_s7 = spop %282 }
 0x10c   :  { %s194_s8 = sadd.f32 %s283_s7, %s281_s6  ;;  %s445_s9 = spop %284 }
 0x10d   :  { %p191_p2 = scmp.eq.f32.partialorder %s283_s7, 0.0  ;;  %s220_s18 = smul.f32 2.0, %s445_s9 }
 0x10e   :  { %v196_v19 = vstv %s194_s8  ;;  %s287_s10 = spop %286 }
 0x10f   :  { %316 = vrcp.f32 %v196_v19  ;;  %s447_s11 = spop %288 }
 0x110   :  { %s222_s12 = sadd.f32 %s447_s11, %s287_s10  ;;  %p219_p3 = scmp.eq.f32.partialorder %s447_s11, 0.0 }
 0x112   :  { %v224_v25 = vstv %s222_s12 }
 0x119   :  { %v317_v20 = vpop.eup %316 }
 0x11a   :  { %290 = vpush %v317_v20 }
 0x14b   :  { %s291_s14 = spop %290 }
 0x14c   :  { %s199_s15 = smul.f32 %s291_s14, %s192_s13 }
 0x14e   :  { %s468_s15 = smov (%p191_p2, %s199_s15), 1.0 }
 0x14f   :  { %v201_v21 = vstv %s468_s15 }
 0x150   :  { %318 = vlog2.f32 %v201_v21 }
 0x15a   :  { %v319_v22 = vpop.eup %318 }
 0x15b   :  { %v203_v23 = vmul.f32 0.6931472, %v319_v22 }
 0x15d   :  { %292 = vpush %v203_v23 }
 0x18e   :  { %s293_s16 = spop %292 }
 0x18f   :  { %s205_s17 = ssub.f32 0.0, %s293_s16 }
 0x191   :  { %v206_v24 = vstv %s205_s17 }
 0x192   :  { %320 = vrsqrt.f32 %v206_v24  ;;  %vm209_vm5 = vcmp.eq.f32.partialorder %v206_v24, inf  ;;  %v212_v28 = vand.u32 2147483648, %v206_v24  ;;  %vm211_vm6 = vcmp.eq.f32.partialorder %v206_v24, 0.0 }
 0x193   :  { %322 = vrcp.f32 %v224_v25 }
 0x19c   :  { %v321_v26 = vpop.eup %320 }
 0x19d   :  { %v208_v27 = vmul.f32 %v321_v26, %v206_v24  ;;  %v323_v31 = vpop.eup %322 }
 0x19f   :  { %v210_v29 = vsel %vm209_vm5, %v206_v24, %v208_v27 }
 0x1a0   :  { %v213_v30 = vsel %vm211_vm6, %v212_v28, %v210_v29 }
 0x1a1   :  { %294 = vpush %v213_v30 }
 0x1a2   :  { %296 = vpush %v323_v31 }
 0x1d2   :  { %s295_s19 = spop %294 }
 0x1d3   :  { %s297_s20 = spop %296 }
 0x1d4   :  { %s227_s21 = smul.f32 %s297_s20, %s220_s18 }
 0x1d6   :  { %s470_s21 = smov (%p219_p3, %s227_s21), 1.0 }
 0x1d7   :  { %v229_v32 = vstv %s470_s21 }
 0x1d8   :  { %324 = vlog2.f32 %v229_v32 }
 0x1e2   :  { %v325_v33 = vpop.eup %324 }
 0x1e3   :  { %v231_v34 = vmul.f32 0.6931472, %v325_v33 }
 0x1e5   :  { %298 = vpush %v231_v34 }
 0x216   :  { %s299_s22 = spop %298 }
 0x217   :  { %s233_s23 = ssub.f32 0.0, %s299_s22 }
 0x219   :  { %v234_v35 = vstv %s233_s23 }
 0x21a   :  { %326 = vrsqrt.f32 %v234_v35  ;;  %vm237_vm7 = vcmp.eq.f32.partialorder %v234_v35, inf  ;;  %v240_v38 = vand.u32 2147483648, %v234_v35  ;;  %vm239_vm8 = vcmp.eq.f32.partialorder %v234_v35, 0.0 }
 0x224   :  { %v327_v36 = vpop.eup %326 }
 0x225   :  { %v236_v37 = vmul.f32 %v327_v36, %v234_v35 }
 0x227   :  { %v238_v39 = vsel %vm237_vm7, %v234_v35, %v236_v37 }
 0x228   :  { %v241_v40 = vsel %vm239_vm8, %v240_v38, %v238_v39 }
 0x229   :  { %300 = vpush %v241_v40 }
 0x25a   :  { %s301_s24 = spop %300 }
 0x25b   :  { %s243_s25 = sadd.f32 %s301_s24, %s295_s19 }
 0x25d   :  { %s246_s26 = smul.f32 0.5, %s243_s25 }
 0x25f   :  { %248 = sst [smem:[#allocation8]] %s246_s26 }
 0x260   :  { %381 = shalt.err (!%p378_p6)
}
 0x261   :  { %s393_s5 = smov [#allocation8]  }
 0x262   :  { %256 = dma.smem_to_hbm %s393_s5, 16, %s466_s2, [#allocation5]  }
 0x263   :  { %386 = dma.done.wait [#allocation5], 16  }
 0x264   :  { %387 = vsyncadd [#allocation5], 4294967280 }
 0x265   :  { %260 = sfence }
 0x266   :  { %261 = vsyncpa [#allocation4], 1 }
 0x267   :  { %262 = vsyncpa [#allocation7], 1 }
 0x268   :  { %263 = vsyncpa [#allocation5], 1 }

</bundles_post_ra>
